<compile_context>
chip_gen: v7x
topology: tpu7x:2x2x1
jax: 0.10.0
libtpu: 0.0.40
codegen_flags: <defaults>
</compile_context>

<pallas_src>
import math
import jax
import jax.numpy as jnp
from jax.experimental import pallas as pl
from jax.experimental.pallas import tpu as pltpu

LANE = 128  # lane-dense pad width for the small softmax output


def _round_up(x, m):
    return (x + m - 1) // m * m


# ----------------------------------------------------------------------------
# Kernel: one batch tile of the whole ICM forward pass
# ----------------------------------------------------------------------------
def icm_kernel(
    state_ref, next_state_ref, action_ref,
    fe_w1_ref, fe_b1_ref, fe_w2_ref, fe_b2_ref,            # feature_encoder
    sf_w1_ref,                                             # [inv_w1a | fwd_w1a]  (F, 2H)
    inv_w1b_ref, inv_b1_ref, inv_w2_ref, inv_b2_ref,       # inverse_model (w2/b2 lane-padded)
    fwd_w1b_ref, fwd_b1_ref, fwd_w2_ref, fwd_b2_ref,       # forward_model
    pred_action_ref, pred_next_feat_ref, next_feat_ref,    # outputs
):
    f32 = jnp.float32
    bf16 = jnp.bfloat16
    T = state_ref.shape[0]          # batch tile
    A = action_ref.shape[-1]        # true action_dim (softmax lanes beyond A masked)
    H = inv_b1_ref.shape[-1]        # hidden = 256

    # ---- feature encoder, run ONCE on stacked [state; next_state] rows (2T, S)
    x2 = jnp.concatenate([state_ref[...], next_state_ref[...]], axis=0)
    h = jnp.dot(x2, fe_w1_ref[...], preferred_element_type=f32) + fe_b1_ref[...]
    h = jnp.maximum(h, 0.0).astype(bf16)
    feat = jnp.dot(h, fe_w2_ref[...], preferred_element_type=f32) + fe_b2_ref[...]

    sf = feat[:T]                   # state features      (T, F) f32
    nsf = feat[T:]                  # next-state features (T, F) f32
    next_feat_ref[...] = nsf

    sf_bf = sf.astype(bf16)
    nsf_bf = nsf.astype(bf16)

    # ---- shared-LHS fused matmul: one (T,F)x(F,2H) dot covers both first layers
    sf_big = jnp.dot(sf_bf, sf_w1_ref[...], preferred_element_type=f32)   # (T, 2H)
    inv_from_sf = sf_big[:, :H]
    fwd_from_sf = sf_big[:, H:]

    # ---- inverse model: Linear(2F,256) -> ReLU -> Linear(256,A) -> Softmax
    h_inv = (inv_from_sf
             + jnp.dot(nsf_bf, inv_w1b_ref[...], preferred_element_type=f32)
             + inv_b1_ref[...])
    h_inv = jnp.maximum(h_inv, 0.0).astype(bf16)
    logits = jnp.dot(h_inv, inv_w2_ref[...], preferred_element_type=f32) + inv_b2_ref[...]
    lane_id = jax.lax.broadcasted_iota(jnp.int32, logits.shape, 1)
    logits = jnp.where(lane_id < A, logits, -1e30)          # mask padded lanes
    m = jnp.max(logits, axis=-1, keepdims=True)
    e = jnp.exp(logits - m)
    denom = jnp.sum(e, axis=-1, keepdims=True)
    pred_action_ref[...] = e * pl.reciprocal(denom, approx=True)

    # ---- forward model: Linear(F+A,256) -> ReLU -> Linear(256,F) -> ReLU
    h_fwd = (fwd_from_sf
             + jnp.dot(action_ref[...], fwd_w1b_ref[...], preferred_element_type=f32)
             + fwd_b1_ref[...])
    h_fwd = jnp.maximum(h_fwd, 0.0).astype(bf16)
    pnf = jnp.dot(h_fwd, fwd_w2_ref[...], preferred_element_type=f32) + fwd_b2_ref[...]
    pred_next_feat_ref[...] = jnp.maximum(pnf, 0.0)


# ----------------------------------------------------------------------------
# Parameter init (torch.nn.Linear-style U(-k, k)); weights stored [in, out].
# Returns (kernel-ready params, reference params with original layout).
# ----------------------------------------------------------------------------
def init_linear(key, in_dim, out_dim):
    k = 1.0 / math.sqrt(in_dim)
    kw, kb = jax.random.split(key)
    w = jax.random.uniform(kw, (in_dim, out_dim), jnp.float32, -k, k)
    b = jax.random.uniform(kb, (1, out_dim), jnp.float32, -k, k)
    return w, b


def init_icm_params(key, state_dim, action_dim, feature_dim=128, hidden=256):
    keys = jax.random.split(key, 6)
    fe_w1, fe_b1 = init_linear(keys[0], state_dim, hidden)
    fe_w2, fe_b2 = init_linear(keys[1], hidden, feature_dim)
    inv_w1, inv_b1 = init_linear(keys[2], 2 * feature_dim, hidden)
    inv_w2, inv_b2 = init_linear(keys[3], hidden, action_dim)
    fwd_w1, fwd_b1 = init_linear(keys[4], feature_dim + action_dim, hidden)
    fwd_w2, fwd_b2 = init_linear(keys[5], hidden, feature_dim)

    ref = dict(fe_w1=fe_w1, fe_b1=fe_b1, fe_w2=fe_w2, fe_b2=fe_b2,
               inv_w1=inv_w1, inv_b1=inv_b1, inv_w2=inv_w2, inv_b2=inv_b2,
               fwd_w1=fwd_w1, fwd_b1=fwd_b1, fwd_w2=fwd_w2, fwd_b2=fwd_b2)

    bf = jnp.bfloat16
    # shared-LHS fusion: both first layers that consume state_feat, packed on N
    sf_w1 = jnp.concatenate([inv_w1[:feature_dim], fwd_w1[:feature_dim]], axis=1)
    # lane-dense pad of the tiny softmax head (zeros; masked in-kernel)
    inv_w2p = jnp.zeros((hidden, LANE), jnp.float32).at[:, :action_dim].set(inv_w2)
    inv_b2p = jnp.zeros((1, LANE), jnp.float32).at[:, :action_dim].set(inv_b2)

    kern = dict(
        fe_w1=fe_w1.astype(bf), fe_b1=fe_b1,
        fe_w2=fe_w2.astype(bf), fe_b2=fe_b2,
        sf_w1=sf_w1.astype(bf),
        inv_w1b=inv_w1[feature_dim:].astype(bf), inv_b1=inv_b1,
        inv_w2=inv_w2p.astype(bf), inv_b2=inv_b2p,
        fwd_w1b=fwd_w1[feature_dim:].astype(bf), fwd_b1=fwd_b1,
        fwd_w2=fwd_w2.astype(bf), fwd_b2=fwd_b2,
    )
    return kern, ref


# ----------------------------------------------------------------------------
# Wrapper: batch-tiled pallas_call with resident weights
# ----------------------------------------------------------------------------
def icm_forward(params, state, next_state, action):
    B, S = state.shape
    A = action.shape[1]
    F = params["fe_w2"].shape[1]
    H = params["fe_w1"].shape[1]
    A_PAD = params["inv_w2"].shape[1]

    # tile rows must be a multiple of 16 (bf16 sublane packing); cap at 256
    tile_b = min(256, _round_up(max(B, 1), 16))
    b_pad = _round_up(B, tile_b)
    pad = b_pad - B

    bf = jnp.bfloat16
    state_p = jnp.pad(state, ((0, pad), (0, 0))).astype(bf)
    next_state_p = jnp.pad(next_state, ((0, pad), (0, 0))).astype(bf)
    action_p = jnp.pad(action, ((0, pad), (0, 0))).astype(bf)

    grid = (b_pad // tile_b,)

    def batch_spec(cols):
        return pl.BlockSpec((tile_b, cols), lambda i: (i, 0))

    def resident_spec(shape):
        return pl.BlockSpec(shape, lambda i: (0, 0))      # weights stay in VMEM

    inputs = (
        state_p, next_state_p, action_p,
        params["fe_w1"], params["fe_b1"], params["fe_w2"], params["fe_b2"],
        params["sf_w1"],
        params["inv_w1b"], params["inv_b1"], params["inv_w2"], params["inv_b2"],
        params["fwd_w1b"], params["fwd_b1"], params["fwd_w2"], params["fwd_b2"],
    )
    in_specs = [batch_spec(S), batch_spec(S), batch_spec(A)]
    in_specs += [resident_spec(tuple(x.shape)) for x in inputs[3:]]

    out_shapes = (
        jax.ShapeDtypeStruct((b_pad, A_PAD), jnp.float32),   # pred_action (lane-padded)
        jax.ShapeDtypeStruct((b_pad, F), jnp.float32),       # pred_next_state_feat
        jax.ShapeDtypeStruct((b_pad, F), jnp.float32),       # next_state_feat
    )
    out_specs = [batch_spec(A_PAD), batch_spec(F), batch_spec(F)]

    # advisory cost hint for the surrounding XLA program
    macs_per_row = (2 * (S * H + H * F) + F * (2 * H) + F * H
                    + H * A_PAD + A * H + H * F)
    cost = pl.CostEstimate(
        flops=int(2 * b_pad * macs_per_row),
        transcendentals=int(b_pad * (A_PAD + 1)),
        bytes_accessed=int(sum(int(x.size) * x.dtype.itemsize for x in inputs)
                           + sum(4 * s.shape[0] * s.shape[1] for s in out_shapes)),
    )

    pred_action, pred_next_feat, next_feat = pl.pallas_call(
        icm_kernel,
        out_shape=out_shapes,
        grid_spec=pltpu.PrefetchScalarGridSpec(
            num_scalar_prefetch=0,
            grid=grid,
            in_specs=in_specs,
            out_specs=out_specs,
        ),
        compiler_params=pltpu.CompilerParams(
            dimension_semantics=("parallel",),
        ),
        cost_estimate=cost,
    )(*inputs)

    # strip batch padding and the lane padding of the softmax head
    return pred_action[:B, :A], pred_next_feat[:B], next_feat[:B]


# ----------------------------------------------------------------------------
# Pure-JAX reference mirroring the PyTorch module (same bf16 matmul numerics)
# ----------------------------------------------------------------------------
def icm_reference(ref_params, state, next_state, action):
    p = ref_params
    bf = jnp.bfloat16

    def bdot(x, w):
        return jnp.dot(x.astype(bf), w.astype(bf), preferred_element_type=jnp.float32)

    def encode(x):
        h = jnp.maximum(bdot(x, p["fe_w1"]) + p["fe_b1"], 0.0)
        return bdot(h, p["fe_w2"]) + p["fe_b2"]

    sf, nsf = encode(state), encode(next_state)
    h = jnp.maximum(bdot(jnp.concatenate([sf, nsf], axis=1), p["inv_w1"]) + p["inv_b1"], 0.0)
    logits = bdot(h, p["inv_w2"]) + p["inv_b2"]
    pred_action = jax.nn.softmax(logits, axis=-1)
    h2 = jnp.maximum(bdot(jnp.concatenate([sf, action], axis=1), p["fwd_w1"]) + p["fwd_b1"], 0.0)
    pred_next = jnp.maximum(bdot(h2, p["fwd_w2"]) + p["fwd_b2"], 0.0)
    return pred_action, pred_next, nsf


if __name__ == "__main__":
    B, STATE_DIM, ACTION_DIM, FEATURE_DIM = 8, 16, 4, 128

    key = jax.random.PRNGKey(0)
    kp, ks, kn, ka = jax.random.split(key, 4)

    kern_params, ref_params = init_icm_params(kp, STATE_DIM, ACTION_DIM, FEATURE_DIM)
    state = jax.random.normal(ks, (B, STATE_DIM), jnp.float32)
    next_state = jax.random.normal(kn, (B, STATE_DIM), jnp.float32)
    action = jax.random.normal(ka, (B, ACTION_DIM), jnp.float32)

    pred_action, pred_next_feat, next_feat = jax.block_until_ready(
        icm_forward(kern_params, state, next_state, action)
    )

    ra, rn, rf = icm_reference(ref_params, state, next_state, action)
    assert pred_action.shape == (B, ACTION_DIM)
    assert pred_next_feat.shape == (B, FEATURE_DIM)
    assert next_feat.shape == (B, FEATURE_DIM)
    # bf16 matmuls + approx reciprocal -> loosened tolerances
    assert jnp.allclose(pred_action, ra, atol=2e-2, rtol=2e-2), "pred_action mismatch"
    assert jnp.allclose(pred_next_feat, rn, atol=2e-2, rtol=2e-2), "pred_next_state_feat mismatch"
    assert jnp.allclose(next_feat, rf, atol=2e-2, rtol=2e-2), "next_state_feat mismatch"

    print("KERNEL_OK")
</pallas_src>

<mosaic_0001>
module attributes {stable_mosaic.version = 11 : i64} {
  func.func @icm_kernel(%arg0: i32, %arg1: memref<16x16xbf16, #tpu.memory_space<vmem>>, %arg2: memref<16x16xbf16, #tpu.memory_space<vmem>>, %arg3: memref<16x4xbf16, #tpu.memory_space<vmem>>, %arg4: memref<16x256xbf16, #tpu.memory_space<vmem>>, %arg5: memref<1x256xf32, #tpu.memory_space<vmem>>, %arg6: memref<256x128xbf16, #tpu.memory_space<vmem>>, %arg7: memref<1x128xf32, #tpu.memory_space<vmem>>, %arg8: memref<128x512xbf16, #tpu.memory_space<vmem>>, %arg9: memref<128x256xbf16, #tpu.memory_space<vmem>>, %arg10: memref<1x256xf32, #tpu.memory_space<vmem>>, %arg11: memref<256x128xbf16, #tpu.memory_space<vmem>>, %arg12: memref<1x128xf32, #tpu.memory_space<vmem>>, %arg13: memref<4x256xbf16, #tpu.memory_space<vmem>>, %arg14: memref<1x256xf32, #tpu.memory_space<vmem>>, %arg15: memref<256x128xbf16, #tpu.memory_space<vmem>>, %arg16: memref<1x128xf32, #tpu.memory_space<vmem>>, %arg17: memref<16x128xf32, #tpu.memory_space<vmem>>, %arg18: memref<16x128xf32, #tpu.memory_space<vmem>>, %arg19: memref<16x128xf32, #tpu.memory_space<vmem>>) attributes {dimension_semantics = [#tpu.dimension_semantics<parallel>], iteration_bounds = array<i64: 1>, scalar_prefetch = 0 : i64, scratch_operands = 0 : i64, tpu.core_type = #tpu.core_type<tc>, window_params = [{transform_indices = @transform_0, window_bounds = array<i64: 16, 16>}, {transform_indices = @transform_1, window_bounds = array<i64: 16, 16>}, {transform_indices = @transform_2, window_bounds = array<i64: 16, 4>}, {pipeline_mode = #tpu.pipeline_mode<synchronous>, transform_indices = @transform_3, window_bounds = array<i64: 16, 256>}, {pipeline_mode = #tpu.pipeline_mode<synchronous>, transform_indices = @transform_4, window_bounds = array<i64: 1, 256>}, {pipeline_mode = #tpu.pipeline_mode<synchronous>, transform_indices = @transform_5, window_bounds = array<i64: 256, 128>}, {pipeline_mode = #tpu.pipeline_mode<synchronous>, transform_indices = @transform_6, window_bounds = array<i64: 1, 128>}, {pipeline_mode = #tpu.pipeline_mode<synchronous>, transform_indices = @transform_7, window_bounds = array<i64: 128, 512>}, {pipeline_mode = #tpu.pipeline_mode<synchronous>, transform_indices = @transform_8, window_bounds = array<i64: 128, 256>}, {pipeline_mode = #tpu.pipeline_mode<synchronous>, transform_indices = @transform_9, window_bounds = array<i64: 1, 256>}, {pipeline_mode = #tpu.pipeline_mode<synchronous>, transform_indices = @transform_10, window_bounds = array<i64: 256, 128>}, {pipeline_mode = #tpu.pipeline_mode<synchronous>, transform_indices = @transform_11, window_bounds = array<i64: 1, 128>}, {pipeline_mode = #tpu.pipeline_mode<synchronous>, transform_indices = @transform_12, window_bounds = array<i64: 4, 256>}, {pipeline_mode = #tpu.pipeline_mode<synchronous>, transform_indices = @transform_13, window_bounds = array<i64: 1, 256>}, {pipeline_mode = #tpu.pipeline_mode<synchronous>, transform_indices = @transform_14, window_bounds = array<i64: 256, 128>}, {pipeline_mode = #tpu.pipeline_mode<synchronous>, transform_indices = @transform_15, window_bounds = array<i64: 1, 128>}, {transform_indices = @transform_16, window_bounds = array<i64: 16, 128>}, {transform_indices = @transform_17, window_bounds = array<i64: 16, 128>}, {transform_indices = @transform_18, window_bounds = array<i64: 16, 128>}]} {
    %c0 = arith.constant 0 : index
    %c0_0 = arith.constant 0 : index
    %0 = vector.load %arg1[%c0, %c0_0] : memref<16x16xbf16, #tpu.memory_space<vmem>>, vector<16x16xbf16>
    %c0_1 = arith.constant 0 : index
    %c0_2 = arith.constant 0 : index
    %1 = vector.load %arg2[%c0_1, %c0_2] : memref<16x16xbf16, #tpu.memory_space<vmem>>, vector<16x16xbf16>
    %2 = tpu.concatenate %0, %1 in 0 : vector<16x16xbf16>, vector<16x16xbf16> -> vector<32x16xbf16>
    %c0_3 = arith.constant 0 : index
    %c0_4 = arith.constant 0 : index
    %3 = vector.load %arg4[%c0_3, %c0_4] : memref<16x256xbf16, #tpu.memory_space<vmem>>, vector<16x256xbf16>
    %cst = arith.constant dense<0.000000e+00> : vector<32x256xf32>
    %4 = tpu.matmul %2, %3, %cst {dimension_numbers = #tpu.dot_dimension_numbers<[1], [0], [0], [1], [0, 0, 1, 1], [], []>} : vector<32x16xbf16>, vector<16x256xbf16>, vector<32x256xf32> -> vector<32x256xf32>
    %c0_5 = arith.constant 0 : index
    %c0_6 = arith.constant 0 : index
    %5 = vector.load %arg5[%c0_5, %c0_6] : memref<1x256xf32, #tpu.memory_space<vmem>>, vector<1x256xf32>
    %6 = vector.broadcast %5 : vector<1x256xf32> to vector<32x256xf32>
    %7 = arith.addf %4, %6 : vector<32x256xf32>
    %cst_7 = arith.constant 0.000000e+00 : f32
    %8 = vector.broadcast %cst_7 : f32 to vector<32x256xf32>
    %9 = arith.maximumf %7, %8 : vector<32x256xf32>
    %10 = arith.truncf %9 : vector<32x256xf32> to vector<32x256xbf16>
    %c0_8 = arith.constant 0 : index
    %c0_9 = arith.constant 0 : index
    %11 = vector.load %arg6[%c0_8, %c0_9] : memref<256x128xbf16, #tpu.memory_space<vmem>>, vector<256x128xbf16>
    %cst_10 = arith.constant dense<0.000000e+00> : vector<32x128xf32>
    %12 = tpu.matmul %10, %11, %cst_10 {dimension_numbers = #tpu.dot_dimension_numbers<[1], [0], [0], [1], [0, 0, 1, 1], [], []>} : vector<32x256xbf16>, vector<256x128xbf16>, vector<32x128xf32> -> vector<32x128xf32>
    %c0_11 = arith.constant 0 : index
    %c0_12 = arith.constant 0 : index
    %13 = vector.load %arg7[%c0_11, %c0_12] : memref<1x128xf32, #tpu.memory_space<vmem>>, vector<1x128xf32>
    %14 = vector.broadcast %13 : vector<1x128xf32> to vector<32x128xf32>
    %15 = arith.addf %12, %14 : vector<32x128xf32>
    %16 = vector.extract_strided_slice %15 {offsets = [0, 0], sizes = [16, 128], strides = [1, 1]} : vector<32x128xf32> to vector<16x128xf32>
    %17 = vector.extract_strided_slice %15 {offsets = [16, 0], sizes = [16, 128], strides = [1, 1]} : vector<32x128xf32> to vector<16x128xf32>
    %c0_13 = arith.constant 0 : index
    %c0_14 = arith.constant 0 : index
    %18 = vector.load %arg19[%c0_13, %c0_14] : memref<16x128xf32, #tpu.memory_space<vmem>>, vector<16x128xf32>
    tpu.vector_store %arg19[%c0_13, %c0_14], %17 {strides = array<i32>} : memref<16x128xf32, #tpu.memory_space<vmem>>, vector<16x128xf32>,
    %19 = arith.truncf %16 : vector<16x128xf32> to vector<16x128xbf16>
    %20 = arith.truncf %17 : vector<16x128xf32> to vector<16x128xbf16>
    %c0_15 = arith.constant 0 : index
    %c0_16 = arith.constant 0 : index
    %21 = vector.load %arg8[%c0_15, %c0_16] : memref<128x512xbf16, #tpu.memory_space<vmem>>, vector<128x512xbf16>
    %cst_17 = arith.constant dense<0.000000e+00> : vector<16x512xf32>
    %22 = tpu.matmul %19, %21, %cst_17 {dimension_numbers = #tpu.dot_dimension_numbers<[1], [0], [0], [1], [0, 0, 1, 1], [], []>} : vector<16x128xbf16>, vector<128x512xbf16>, vector<16x512xf32> -> vector<16x512xf32>
    %23 = vector.extract_strided_slice %22 {offsets = [0, 0], sizes = [16, 256], strides = [1, 1]} : vector<16x512xf32> to vector<16x256xf32>
    %24 = vector.extract_strided_slice %22 {offsets = [0, 256], sizes = [16, 256], strides = [1, 1]} : vector<16x512xf32> to vector<16x256xf32>
    %c0_18 = arith.constant 0 : index
    %c0_19 = arith.constant 0 : index
    %25 = vector.load %arg9[%c0_18, %c0_19] : memref<128x256xbf16, #tpu.memory_space<vmem>>, vector<128x256xbf16>
    %cst_20 = arith.constant dense<0.000000e+00> : vector<16x256xf32>
    %26 = tpu.matmul %20, %25, %cst_20 {dimension_numbers = #tpu.dot_dimension_numbers<[1], [0], [0], [1], [0, 0, 1, 1], [], []>} : vector<16x128xbf16>, vector<128x256xbf16>, vector<16x256xf32> -> vector<16x256xf32>
    %27 = arith.addf %23, %26 : vector<16x256xf32>
    %c0_21 = arith.constant 0 : index
    %c0_22 = arith.constant 0 : index
    %28 = vector.load %arg10[%c0_21, %c0_22] : memref<1x256xf32, #tpu.memory_space<vmem>>, vector<1x256xf32>
    %29 = vector.broadcast %28 : vector<1x256xf32> to vector<16x256xf32>
    %30 = arith.addf %27, %29 : vector<16x256xf32>
    %cst_23 = arith.constant 0.000000e+00 : f32
    %31 = vector.broadcast %cst_23 : f32 to vector<16x256xf32>
    %32 = arith.maximumf %30, %31 : vector<16x256xf32>
    %33 = arith.truncf %32 : vector<16x256xf32> to vector<16x256xbf16>
    %c0_24 = arith.constant 0 : index
    %c0_25 = arith.constant 0 : index
    %34 = vector.load %arg11[%c0_24, %c0_25] : memref<256x128xbf16, #tpu.memory_space<vmem>>, vector<256x128xbf16>
    %cst_26 = arith.constant dense<0.000000e+00> : vector<16x128xf32>
    %35 = tpu.matmul %33, %34, %cst_26 {dimension_numbers = #tpu.dot_dimension_numbers<[1], [0], [0], [1], [0, 0, 1, 1], [], []>} : vector<16x256xbf16>, vector<256x128xbf16>, vector<16x128xf32> -> vector<16x128xf32>
    %c0_27 = arith.constant 0 : index
    %c0_28 = arith.constant 0 : index
    %36 = vector.load %arg12[%c0_27, %c0_28] : memref<1x128xf32, #tpu.memory_space<vmem>>, vector<1x128xf32>
    %37 = vector.broadcast %36 : vector<1x128xf32> to vector<16x128xf32>
    %38 = arith.addf %35, %37 : vector<16x128xf32>
    %39 = tpu.iota {dimensions = array<i32: 1>} : vector<16x128xi32>
    %c4_i32 = arith.constant 4 : i32
    %40 = vector.broadcast %c4_i32 : i32 to vector<16x128xi32>
    %41 = arith.cmpi slt, %39, %40 : vector<16x128xi32>
    %cst_29 = arith.constant -1.000000e+30 : f32
    %42 = vector.broadcast %cst_29 : f32 to vector<16x128xf32>
    %43 = arith.select %41, %38, %42 : vector<16x128xi1>, vector<16x128xf32>
    %cst_30 = arith.constant dense<0xFF800000> : vector<16xf32>
    %44 = vector.multi_reduction <maximumf>, %43, %cst_30 [1] : vector<16x128xf32> to vector<16xf32>
    %45 = vector.shape_cast %44 : vector<16xf32> to vector<16x1xf32>
    %46 = vector.broadcast %45 : vector<16x1xf32> to vector<16x128xf32>
    %47 = arith.subf %43, %46 : vector<16x128xf32>
    %48 = math.exp %47 : vector<16x128xf32>
    %cst_31 = arith.constant dense<0.000000e+00> : vector<16xf32>
    %49 = vector.multi_reduction <add>, %48, %cst_31 [1] : vector<16x128xf32> to vector<16xf32>
    %50 = vector.shape_cast %49 : vector<16xf32> to vector<16x1xf32>
    %51 = tpu.reciprocal %50 {approx = true} : vector<16x1xf32> -> vector<16x1xf32>
    %52 = vector.broadcast %51 : vector<16x1xf32> to vector<16x128xf32>
    %53 = arith.mulf %48, %52 : vector<16x128xf32>
    %c0_32 = arith.constant 0 : index
    %c0_33 = arith.constant 0 : index
    %54 = vector.load %arg17[%c0_32, %c0_33] : memref<16x128xf32, #tpu.memory_space<vmem>>, vector<16x128xf32>
    tpu.vector_store %arg17[%c0_32, %c0_33], %53 {strides = array<i32>} : memref<16x128xf32, #tpu.memory_space<vmem>>, vector<16x128xf32>,
    %c0_34 = arith.constant 0 : index
    %c0_35 = arith.constant 0 : index
    %55 = vector.load %arg3[%c0_34, %c0_35] : memref<16x4xbf16, #tpu.memory_space<vmem>>, vector<16x4xbf16>
    %c0_36 = arith.constant 0 : index
    %c0_37 = arith.constant 0 : index
    %56 = vector.load %arg13[%c0_36, %c0_37] : memref<4x256xbf16, #tpu.memory_space<vmem>>, vector<4x256xbf16>
    %cst_38 = arith.constant dense<0.000000e+00> : vector<16x256xf32>
    %57 = tpu.matmul %55, %56, %cst_38 {dimension_numbers = #tpu.dot_dimension_numbers<[1], [0], [0], [1], [0, 0, 1, 1], [], []>} : vector<16x4xbf16>, vector<4x256xbf16>, vector<16x256xf32> -> vector<16x256xf32>
    %58 = arith.addf %24, %57 : vector<16x256xf32>
    %c0_39 = arith.constant 0 : index
    %c0_40 = arith.constant 0 : index
    %59 = vector.load %arg14[%c0_39, %c0_40] : memref<1x256xf32, #tpu.memory_space<vmem>>, vector<1x256xf32>
    %60 = vector.broadcast %59 : vector<1x256xf32> to vector<16x256xf32>
    %61 = arith.addf %58, %60 : vector<16x256xf32>
    %cst_41 = arith.constant 0.000000e+00 : f32
    %62 = vector.broadcast %cst_41 : f32 to vector<16x256xf32>
    %63 = arith.maximumf %61, %62 : vector<16x256xf32>
    %64 = arith.truncf %63 : vector<16x256xf32> to vector<16x256xbf16>
    %c0_42 = arith.constant 0 : index
    %c0_43 = arith.constant 0 : index
    %65 = vector.load %arg15[%c0_42, %c0_43] : memref<256x128xbf16, #tpu.memory_space<vmem>>, vector<256x128xbf16>
    %cst_44 = arith.constant dense<0.000000e+00> : vector<16x128xf32>
    %66 = tpu.matmul %64, %65, %cst_44 {dimension_numbers = #tpu.dot_dimension_numbers<[1], [0], [0], [1], [0, 0, 1, 1], [], []>} : vector<16x256xbf16>, vector<256x128xbf16>, vector<16x128xf32> -> vector<16x128xf32>
    %c0_45 = arith.constant 0 : index
    %c0_46 = arith.constant 0 : index
    %67 = vector.load %arg16[%c0_45, %c0_46] : memref<1x128xf32, #tpu.memory_space<vmem>>, vector<1x128xf32>
    %68 = vector.broadcast %67 : vector<1x128xf32> to vector<16x128xf32>
    %69 = arith.addf %66, %68 : vector<16x128xf32>
    %cst_47 = arith.constant 0.000000e+00 : f32
    %70 = vector.broadcast %cst_47 : f32 to vector<16x128xf32>
    %71 = arith.maximumf %69, %70 : vector<16x128xf32>
    %c0_48 = arith.constant 0 : index
    %c0_49 = arith.constant 0 : index
    %72 = vector.load %arg18[%c0_48, %c0_49] : memref<16x128xf32, #tpu.memory_space<vmem>>, vector<16x128xf32>
    tpu.vector_store %arg18[%c0_48, %c0_49], %71 {strides = array<i32>} : memref<16x128xf32, #tpu.memory_space<vmem>>, vector<16x128xf32>,
    return
  }
  func.func @transform_0(%arg0: i32) -> (i32, i32) {
    %c0_i32 = arith.constant 0 : i32
    %c0_i32_0 = arith.constant 0 : i32
    return %arg0, %c0_i32 : i32, i32
  }
  func.func @transform_1(%arg0: i32) -> (i32, i32) {
    %c0_i32 = arith.constant 0 : i32
    %c0_i32_0 = arith.constant 0 : i32
    return %arg0, %c0_i32 : i32, i32
  }
  func.func @transform_2(%arg0: i32) -> (i32, i32) {
    %c0_i32 = arith.constant 0 : i32
    %c0_i32_0 = arith.constant 0 : i32
    return %arg0, %c0_i32 : i32, i32
  }
  func.func @transform_3(%arg0: i32) -> (i32, i32) {
    %c0_i32 = arith.constant 0 : i32
    %c0_i32_0 = arith.constant 0 : i32
    %c0_i32_1 = arith.constant 0 : i32
    return %c0_i32, %c0_i32_0 : i32, i32
  }
  func.func @transform_4(%arg0: i32) -> (i32, i32) {
    %c0_i32 = arith.constant 0 : i32
    %c0_i32_0 = arith.constant 0 : i32
    %c0_i32_1 = arith.constant 0 : i32
    return %c0_i32, %c0_i32_0 : i32, i32
  }
  func.func @transform_5(%arg0: i32) -> (i32, i32) {
    %c0_i32 = arith.constant 0 : i32
    %c0_i32_0 = arith.constant 0 : i32
    %c0_i32_1 = arith.constant 0 : i32
    return %c0_i32, %c0_i32_0 : i32, i32
  }
  func.func @transform_6(%arg0: i32) -> (i32, i32) {
    %c0_i32 = arith.constant 0 : i32
    %c0_i32_0 = arith.constant 0 : i32
    %c0_i32_1 = arith.constant 0 : i32
    return %c0_i32, %c0_i32_0 : i32, i32
  }
  func.func @transform_7(%arg0: i32) -> (i32, i32) {
    %c0_i32 = arith.constant 0 : i32
    %c0_i32_0 = arith.constant 0 : i32
    %c0_i32_1 = arith.constant 0 : i32
    return %c0_i32, %c0_i32_0 : i32, i32
  }
  func.func @transform_8(%arg0: i32) -> (i32, i32) {
    %c0_i32 = arith.constant 0 : i32
    %c0_i32_0 = arith.constant 0 : i32
    %c0_i32_1 = arith.constant 0 : i32
    return %c0_i32, %c0_i32_0 : i32, i32
  }
  func.func @transform_9(%arg0: i32) -> (i32, i32) {
    %c0_i32 = arith.constant 0 : i32
    %c0_i32_0 = arith.constant 0 : i32
    %c0_i32_1 = arith.constant 0 : i32
    return %c0_i32, %c0_i32_0 : i32, i32
  }
  func.func @transform_10(%arg0: i32) -> (i32, i32) {
    %c0_i32 = arith.constant 0 : i32
    %c0_i32_0 = arith.constant 0 : i32
    %c0_i32_1 = arith.constant 0 : i32
    return %c0_i32, %c0_i32_0 : i32, i32
  }
  func.func @transform_11(%arg0: i32) -> (i32, i32) {
    %c0_i32 = arith.constant 0 : i32
    %c0_i32_0 = arith.constant 0 : i32
    %c0_i32_1 = arith.constant 0 : i32
    return %c0_i32, %c0_i32_0 : i32, i32
  }
  func.func @transform_12(%arg0: i32) -> (i32, i32) {
    %c0_i32 = arith.constant 0 : i32
    %c0_i32_0 = arith.constant 0 : i32
    %c0_i32_1 = arith.constant 0 : i32
    return %c0_i32, %c0_i32_0 : i32, i32
  }
  func.func @transform_13(%arg0: i32) -> (i32, i32) {
    %c0_i32 = arith.constant 0 : i32
    %c0_i32_0 = arith.constant 0 : i32
    %c0_i32_1 = arith.constant 0 : i32
    return %c0_i32, %c0_i32_0 : i32, i32
  }
  func.func @transform_14(%arg0: i32) -> (i32, i32) {
    %c0_i32 = arith.constant 0 : i32
    %c0_i32_0 = arith.constant 0 : i32
    %c0_i32_1 = arith.constant 0 : i32
    return %c0_i32, %c0_i32_0 : i32, i32
  }
  func.func @transform_15(%arg0: i32) -> (i32, i32) {
    %c0_i32 = arith.constant 0 : i32
    %c0_i32_0 = arith.constant 0 : i32
    %c0_i32_1 = arith.constant 0 : i32
    return %c0_i32, %c0_i32_0 : i32, i32
  }
  func.func @transform_16(%arg0: i32) -> (i32, i32) {
    %c0_i32 = arith.constant 0 : i32
    %c0_i32_0 = arith.constant 0 : i32
    return %arg0, %c0_i32 : i32, i32
  }
  func.func @transform_17(%arg0: i32) -> (i32, i32) {
    %c0_i32 = arith.constant 0 : i32
    %c0_i32_0 = arith.constant 0 : i32
    return %arg0, %c0_i32 : i32, i32
  }
  func.func @transform_18(%arg0: i32) -> (i32, i32) {
    %c0_i32 = arith.constant 0 : i32
    %c0_i32_0 = arith.constant 0 : i32
    return %arg0, %c0_i32 : i32, i32
  }
}

</mosaic_0001>

<bundles_post_ra>
// kernel: tpu_custom_call.1
= control target key start
LH: loop header
LB: loop body
LE: loop exit
PB: predicated region body
PF: predicated region fallthrough
CT: control target
= control target key end

     0   :  { %s2333_s0 = inlined_call_operand.hbm [shape: bf16[16,16], index: 0, kind: input, shape index: {}]   ;;  %s2334_s1 = inlined_call_operand.hbm [shape: bf16[16,16], index: 1, kind: input, shape index: {}]   ;;  %s2335_s2 = inlined_call_operand.vmem [shape: bf16[16,4], index: 2, kind: input, shape index: {}]   ;;  %s2336_s3 = inlined_call_operand.vmem [shape: bf16[16,256], index: 3, kind: input, shape index: {}]   ;;  %s2337_s4 = inlined_call_operand.vmem [shape: f32[1,256], index: 4, kind: input, shape index: {}]   ;;  %s2338_s5 = inlined_call_operand.hbm [shape: bf16[256,128], index: 5, kind: input, shape index: {}]   ;;  %s2339_s6 = inlined_call_operand.vmem [shape: f32[1,128], index: 6, kind: input, shape index: {}]   ;;  %s2340_s7 = inlined_call_operand.hbm [shape: bf16[128,512], index: 7, kind: input, shape index: {}]   ;;  %s2341_s8 = inlined_call_operand.hbm [shape: bf16[128,256], index: 8, kind: input, shape index: {}]   ;;  %s2342_s9 = inlined_call_operand.vmem [shape: f32[1,256], index: 9, kind: input, shape index: {}]   ;;  %s2343_s10 = inlined_call_operand.hbm [shape: bf16[256,128], index: 10, kind: input, shape index: {}]   ;;  %s2344_s11 = inlined_call_operand.vmem [shape: f32[1,128], index: 11, kind: input, shape index: {}]   ;;  %s2345_s12 = inlined_call_operand.vmem [shape: bf16[4,256], index: 12, kind: input, shape index: {}]   ;;  %s2346_s13 = inlined_call_operand.vmem [shape: f32[1,256], index: 13, kind: input, shape index: {}]   ;;  %s2347_s14 = inlined_call_operand.hbm [shape: bf16[256,128], index: 14, kind: input, shape index: {}]   ;;  %s2348_s15 = inlined_call_operand.vmem [shape: f32[1,128], index: 15, kind: input, shape index: {}]   ;;  %s2349_s16 = inlined_call_operand.hbm [shape: f32[16,128], index: 16, kind: output, shape index: {0}]   ;;  %s2350_s17 = inlined_call_operand.hbm [shape: f32[16,128], index: 17, kind: output, shape index: {1}]   ;;  %s2351_s18 = inlined_call_operand.hbm [shape: f32[16,128], index: 18, kind: output, shape index: {2}]  }
   0x1   :  { %2359 = sst [smem:[#allocation24_spill]] %s2333_s0 }
   0x2   :  { %2360 = sst [smem:[#allocation25_spill]] %s2334_s1 }
   0x3   :  { %2361 = sst [smem:[#allocation26_spill]] %s2335_s2 }
   0x4   :  { %2362 = sst [smem:[#allocation27_spill]] %s2349_s16 }
   0x5   :  { %24 = vsyncpa [#allocation3], 0 }
   0x6   :  { %25 = vsyncpa [#allocation6], 0 }
   0x7   :  { %26 = vsyncpa [#allocation9], 0 }
   0x8   :  { %27 = vsyncpa [#allocation12], 0 }
   0x9   :  { %28 = vsyncpa [#allocation4], 0 }
   0xa   :  { %29 = vsyncpa [#allocation16], 0  ;;  %s1996_s27 = smov [#allocation5]   ;;  %s1997_s29 = smov [#allocation8]  }
   0xb   :  { %s47_s28 = sshll.u32 %s1996_s27, 4  ;;  %s79_s30 = sshll.u32 %s1997_s29, 4  ;;  %s48_s28 = int_to_ptr.vmem [resolvable:$true] %s47_s28  ;;  %s2108_s30 = int_to_ptr.vmem [resolvable:$true] %s79_s30 }
   0xc   :  { %s2363_s1 = sld [smem:[#allocation25_spill]] }
  0x12   :  { %s1764_s20 = scalar_lea.hbm %s2363_s1, 128 }
  0x13   :  { %p1765_p0 = scmp.ne.s32.totalorder %s2363_s1, %s1764_s20  ;;  %p1768_p1 = scmp.lt.u32.totalorder %s1764_s20, %s2363_s1 }
  0x15   :  { %p1770_p2 = pnand %p1768_p1, %p1765_p0 }
  0x17   :  { %1773 = shalt.err (!%p1770_p2)
}
  0x18   :  { %s1774_s24 = scalar_lea.vmem %s48_s28, 128  ;;  %p1779_p4 = scmp.lt.s32.totalorder %s48_s28, %s48_s28 }
  0x19   :  { %p1775_p3 = scmp.ne.s32.totalorder %s48_s28, %s1774_s24  ;;  %p1780_p5 = scmp.lt.s32.totalorder %s1774_s24, %s1774_s24 }
  0x1b   :  { %p1781_p6 = por %p1780_p5, %p1779_p4 }
  0x1d   :  { %p1782_p7 = pnand %p1781_p6, %p1775_p3 }
  0x1f   :  { %1785 = shalt.err (!%p1782_p7)
}
  0x20   :  { %s2354_s25 = smov 64   ;;  %s2356_s26 = smov 4  }
  0x21   :  { %53 = dma.hbm_to_vmem [thread:$0]  %s2363_s1, 128, %s48_s28, [#allocation6], %s2354_s25, %s2354_s25, %s2356_s26  }
  0x22   :  { %s1786_s20 = scalar_lea.hbm %s2340_s7, 4096 }
  0x23   :  { %p1787_p8 = scmp.ne.s32.totalorder %s2340_s7, %s1786_s20  ;;  %p1790_p9 = scmp.lt.u32.totalorder %s1786_s20, %s2340_s7 }
  0x25   :  { %p1792_p10 = pnand %p1790_p9, %p1787_p8 }
  0x27   :  { %1795 = shalt.err (!%p1792_p10)
}
  0x28   :  { %s1796_s24 = scalar_lea.vmem %s2108_s30, 4096  ;;  %p1801_p12 = scmp.lt.s32.totalorder %s2108_s30, %s2108_s30 }
  0x29   :  { %p1797_p11 = scmp.ne.s32.totalorder %s2108_s30, %s1796_s24  ;;  %p1802_p13 = scmp.lt.s32.totalorder %s1796_s24, %s1796_s24 }
  0x2b   :  { %p1803_p0 = por %p1802_p13, %p1801_p12 }
  0x2d   :  { %p1804_p1 = pnand %p1803_p0, %p1797_p11 }
  0x2f   :  { %1807 = shalt.err (!%p1804_p1)
}
  0x30   :  { %s2000_s28 = smov 256   ;;  %s2001_s1 = smov 16  }
  0x31   :  { %85 = dma.hbm_to_vmem [thread:$0]  %s2340_s7, 4096, %s2108_s30, [#allocation9], %s2000_s28, %s2000_s28, %s2001_s1  }
  0x32   :  { %s2002_s0 = smov [#allocation11]   ;;  %s2003_s20 = smov [#allocation2]  }
  0x33   :  { %s105_s19 = sshll.u32 %s2002_s0, 4  ;;  %s35_s21 = sshll.u32 %s2003_s20, 4  ;;  %s106_s19 = int_to_ptr.vmem [resolvable:$true] %s105_s19  ;;  %s2142_s21 = int_to_ptr.vmem [resolvable:$true] %s35_s21 }
  0x34   :  { %s1808_s23 = scalar_lea.hbm %s2343_s10, 2048 }
  0x35   :  { %p1809_p2 = scmp.ne.s32.totalorder %s2343_s10, %s1808_s23  ;;  %p1812_p3 = scmp.lt.u32.totalorder %s1808_s23, %s2343_s10 }
  0x37   :  { %p1814_p4 = pnand %p1812_p3, %p1809_p2 }
  0x39   :  { %1817 = shalt.err (!%p1814_p4)
}
  0x3a   :  { %s1818_s7 = scalar_lea.vmem %s106_s19, 2048  ;;  %p1823_p6 = scmp.lt.s32.totalorder %s106_s19, %s106_s19 }
  0x3b   :  { %p1819_p5 = scmp.ne.s32.totalorder %s106_s19, %s1818_s7  ;;  %p1824_p7 = scmp.lt.s32.totalorder %s1818_s7, %s1818_s7 }
  0x3d   :  { %p1825_p8 = por %p1824_p7, %p1823_p6 }
  0x3f   :  { %p1826_p9 = pnand %p1825_p8, %p1819_p5 }
  0x41   :  { %1829 = shalt.err (!%p1826_p9)
}
  0x42   :  { %s2364_s30 = smov 4   ;;  %s2365_s28 = smov 64  }
  0x43   :  { %111 = dma.hbm_to_vmem [thread:$0]  %s2343_s10, 2048, %s106_s19, [#allocation12], %s2365_s28, %s2365_s28, %s2364_s30  }
  0x44   :  { %s2366_s16 = sld [smem:[#allocation24_spill]] }
  0x4a   :  { %s1830_s26 = scalar_lea.hbm %s2366_s16, 128 }
  0x4b   :  { %p1831_p10 = scmp.ne.s32.totalorder %s2366_s16, %s1830_s26  ;;  %p1834_p11 = scmp.lt.u32.totalorder %s1830_s26, %s2366_s16 }
  0x4d   :  { %p1836_p12 = pnand %p1834_p11, %p1831_p10 }
  0x4f   :  { %1839 = shalt.err (!%p1836_p12)
}
  0x50   :  { %s1840_s23 = scalar_lea.vmem %s2142_s21, 128  ;;  %p1845_p0 = scmp.lt.s32.totalorder %s2142_s21, %s2142_s21 }
  0x51   :  { %p1841_p13 = scmp.ne.s32.totalorder %s2142_s21, %s1840_s23  ;;  %p1846_p1 = scmp.lt.s32.totalorder %s1840_s23, %s1840_s23 }
  0x53   :  { %p1847_p2 = por %p1846_p1, %p1845_p0 }
  0x55   :  { %p1848_p3 = pnand %p1847_p2, %p1841_p13 }
  0x57   :  { %1851 = shalt.err (!%p1848_p3)
}
  0x58   :  { %41 = dma.hbm_to_vmem [thread:$0]  %s2366_s16, 128, %s2142_s21, [#allocation3], %s2365_s28, %s2365_s28, %s2364_s30  }
  0x59   :  { %s2004_s24 = smov [#allocation7]   ;;  %s2005_s1 = smov [#allocation10]  }
  0x5a   :  { %s65_s7 = sshll.u32 %s2004_s24, 4  ;;  %s91_s27 = sshll.u32 %s2005_s1, 4  ;;  %s66_s7 = int_to_ptr.vmem [resolvable:$true] %s65_s7  ;;  %s2179_s27 = int_to_ptr.vmem [resolvable:$true] %s91_s27 }
  0x5b   :  { %s1852_s26 = scalar_lea.hbm %s2338_s5, 2048 }
  0x5c   :  { %p1853_p4 = scmp.ne.s32.totalorder %s2338_s5, %s1852_s26  ;;  %p1856_p5 = scmp.lt.u32.totalorder %s1852_s26, %s2338_s5 }
  0x5e   :  { %p1858_p6 = pnand %p1856_p5, %p1853_p4 }
  0x60   :  { %1861 = shalt.err (!%p1858_p6)
}
  0x61   :  { %s1862_s21 = scalar_lea.vmem %s66_s7, 2048  ;;  %p1867_p8 = scmp.lt.s32.totalorder %s66_s7, %s66_s7 }
  0x62   :  { %p1863_p7 = scmp.ne.s32.totalorder %s66_s7, %s1862_s21  ;;  %p1868_p9 = scmp.lt.s32.totalorder %s1862_s21, %s1862_s21 }
  0x64   :  { %p1869_p10 = por %p1868_p9, %p1867_p8 }
  0x66   :  { %p1870_p11 = pnand %p1869_p10, %p1863_p7 }
  0x68   :  { %1873 = shalt.err (!%p1870_p11)
}
  0x69   :  { %71 = dma.hbm_to_vmem [thread:$0]  %s2338_s5, 2048, %s66_s7, [#allocation6], %s2365_s28, %s2365_s28, %s2364_s30  }
  0x6a   :  { %s1874_s24 = scalar_lea.hbm %s2341_s8, 2048 }
  0x6b   :  { %p1875_p12 = scmp.ne.s32.totalorder %s2341_s8, %s1874_s24  ;;  %p1878_p13 = scmp.lt.u32.totalorder %s1874_s24, %s2341_s8 }
  0x6d   :  { %p1880_p0 = pnand %p1878_p13, %p1875_p12 }
  0x6f   :  { %1883 = shalt.err (!%p1880_p0)
}
  0x70   :  { %s1884_s0 = scalar_lea.vmem %s2179_s27, 2048  ;;  %p1889_p2 = scmp.lt.s32.totalorder %s2179_s27, %s2179_s27 }
  0x71   :  { %p1885_p1 = scmp.ne.s32.totalorder %s2179_s27, %s1884_s0  ;;  %p1890_p3 = scmp.lt.s32.totalorder %s1884_s0, %s1884_s0 }
  0x73   :  { %p1891_p4 = por %p1890_p3, %p1889_p2 }
  0x75   :  { %p1892_p5 = pnand %p1891_p4, %p1885_p1 }
  0x77   :  { %1895 = shalt.err (!%p1892_p5)
}
  0x78   :  { %s2006_s5 = smov 128   ;;  %s2007_s7 = smov 8  }
  0x79   :  { %97 = dma.hbm_to_vmem [thread:$0]  %s2341_s8, 2048, %s2179_s27, [#allocation9], %s2006_s5, %s2006_s5, %s2007_s7  }
  0x7a   :  { %s2008_s2 = smov [#allocation13]   ;;  %s1896_s10 = scalar_lea.hbm %s2347_s14, 2048 }
  0x7b   :  { %s123_s21 = sshll.u32 %s2008_s2, 4  ;;  %p1897_p6 = scmp.ne.s32.totalorder %s2347_s14, %s1896_s10  ;;  %s124_s21 = int_to_ptr.vmem [resolvable:$true] %s123_s21 }
  0x7c   :  { %p1900_p7 = scmp.lt.u32.totalorder %s1896_s10, %s2347_s14 }
  0x7e   :  { %p1902_p8 = pnand %p1900_p7, %p1897_p6 }
  0x80   :  { %1905 = shalt.err (!%p1902_p8)
}
  0x81   :  { %s1906_s29 = scalar_lea.vmem %s124_s21, 2048  ;;  %p1911_p10 = scmp.lt.s32.totalorder %s124_s21, %s124_s21 }
  0x82   :  { %p1907_p9 = scmp.ne.s32.totalorder %s124_s21, %s1906_s29  ;;  %p1912_p11 = scmp.lt.s32.totalorder %s1906_s29, %s1906_s29 }
  0x84   :  { %p1913_p12 = por %p1912_p11, %p1911_p10 }
  0x86   :  { %p1914_p13 = pnand %p1913_p12, %p1907_p9 }
  0x88   :  { %1917 = shalt.err (!%p1914_p13)
}
  0x89   :  { %129 = dma.hbm_to_vmem [thread:$0]  %s2347_s14, 2048, %s124_s21, [#allocation12], %s2365_s28, %s2365_s28, %s2364_s30  }
  0x8a   :  { %1984 = dma.done.wait [#allocation3], 128  }
  0x8b   :  { %1985 = vsyncadd [#allocation3], 4294967168 }
  0x8c   :  { %1986 = dma.done.wait [#allocation6], 2176  }
  0x8d   :  { %1987 = vsyncadd [#allocation6], 4294965120 }
  0x8e   :  { %1988 = dma.done.wait [#allocation9], 6144  }
  0x8f   :  { %1989 = vsyncadd [#allocation9], 4294961152 }
  0x90   :  { %1990 = dma.done.wait [#allocation12], 4096  }
  0x91   :  { %1991 = vsyncadd [#allocation12], 4294963200  ;;  %v2009_v0 = vmov 0   ;;  %v1630_v1 = vld [vmem:[%s2336_s3 + $0x4] ss:$8 sps:$4 sm:$0xff]   ;;  %vm192_vm0 = vcmask 130048   ;;  %v172_v34 = vlaneseq }
  0x92   :  { %231 = vmatprep.mubr.bf16.mxu0 %v2009_v0  ;;  %v1632_v2 = vld [vmem:[%s2336_s3] ss:$8 sps:$4 sm:$0xff]   ;;  %199 = vmatprep.subr.bf16.mxu0 %v1630_v1  ;;  %v1635_v4 = vld [vmem:[#allocation7 + $0x40] sm:$0xff]   ;;  %v1637_v6 = vld [vmem:[#allocation7 + $0x48] sm:$0xff]   ;;  %vm1117_vm1 = vcmask 1041408   ;;  %s2367_s16 = sld [smem:[#allocation26_spill]] }
  0x93   :  { %v1633_v3 = vld [vmem:[#allocation2] sm:$0xff]   ;;  %200 = vmatpush1.bf16.msra.mxu0 %v1632_v2  ;;  %v1636_v5 = vld [vmem:[#allocation7] sm:$0xff]   ;;  %1533 = vmatprep.subr.bf16.mxu1 %v1635_v4  ;;  %v1638_v7 = vld [vmem:[#allocation7 + $0x8] sm:$0xff]   ;;  %v173_v35 = vshrl.u32 %v172_v34, 7  ;;  %vm1113_vm2 = vcmask 31744   ;;  %s2010_s1 = smov [#allocation15]  }
  0x94   :  { %1534 = vmatpush3.bf16.msra.mxu1 %v1636_v5  ;;  %v1639_v8 = vld [vmem:[#allocation7 + $0x50] sm:$0xff]   ;;  %v1634_v9 = vld [vmem:[#allocation5] sm:$0xff]   ;;  %v1643_v13 = vld [vmem:[#allocation7 + $0x60] sm:$0xff]   ;;  %s1390_s25 = sshll.u32 %s2010_s1, 4  ;;  %s2011_s29 = smov [#allocation17]   ;;  %s1391_s25 = int_to_ptr.vmem [resolvable:$true] %s1390_s25 }
  0x95   :  { %1535 = vmatprep.subr.bf16.mxu1 %v1637_v6  ;;  %v1640_v10 = vld [vmem:[#allocation7 + $0x10] sm:$0xff]   ;;  %v1641_v11 = vld [vmem:[#allocation7 + $0x58] sm:$0xff]   ;;  %v1644_v14 = vld [vmem:[#allocation7 + $0x20] sm:$0xff]   ;;  %v2243_v36 = vsub.s32 0, %v173_v35  ;;  %v2248_v38 = vsub.s32 1, %v173_v35  ;;  %s1402_s8 = sshll.u32 %s2011_s29, 4  ;;  %p1923_p1 = scmp.lt.s32.totalorder %s1391_s25, %s1391_s25  ;;  %s2281_s8 = int_to_ptr.vmem [resolvable:$true] %s1402_s8 }
  0x96   :  { %1428 = vmatmul.mubr.msk.bf16.vlgmr.msra.gmra.mrb[0].mxu0 %vm192_vm0, %v1633_v3  ;;  %v1642_v12 = vld [vmem:[#allocation7 + $0x18] sm:$0xff]   ;;  %v1645_v15 = vld [vmem:[#allocation7 + $0x68] sm:$0xff]   ;;  %v1647_v17 = vld [vmem:[#allocation7 + $0x70] sm:$0xff]   ;;  %s1918_s27 = scalar_lea.vmem %s1391_s25, 256 }
  0x97   :  { %241 = vmatprep.mubr.bf16.mxu0 %v2009_v0  ;;  %v1646_v16 = vld [vmem:[#allocation7 + $0x28] sm:$0xff]   ;;  %v1648_v18 = vld [vmem:[#allocation7 + $0x30] sm:$0xff]   ;;  %v1649_v19 = vld [vmem:[#allocation7 + $0x78] sm:$0xff]   ;;  %p1919_p0 = scmp.ne.s32.totalorder %s1391_s25, %s1918_s27  ;;  %p1924_p2 = scmp.lt.s32.totalorder %s1918_s27, %s1918_s27 }
  0x98   :  { %1536 = vmatpush3.bf16.msra.mxu1 %v1638_v7  ;;  %v1650_v20 = vld [vmem:[#allocation7 + $0x38] sm:$0xff]   ;;  %v1651_v21 = vld [vmem:[#allocation8] ss:$16 sps:$4 sm:$0xff]   ;;  %v1653_v22 = vld [vmem:[#allocation8 + $0x4] ss:$16 sps:$4 sm:$0xff]  }
  0x99   :  { %1537 = vmatprep.subr.bf16.mxu1 %v1639_v8  ;;  %v1656_v23 = vld [vmem:[#allocation8 + $0xc] ss:$16 sps:$4 sm:$0xff]   ;;  %v1659_v24 = vld [vmem:[#allocation8 + $0x24] ss:$16 sps:$4 sm:$0xff]   ;;  %644 = vmatprep.subr.bf16.mxu0 %v1653_v22  ;;  %v1657_v25 = vld [vmem:[#allocation8 + $0x20] ss:$16 sps:$4 sm:$0xff]   ;;  %p1925_p3 = por %p1924_p2, %p1923_p1 }
  0x9a   :  { %645 = vmatpush1.bf16.msra.mxu0 %v1651_v21  ;;  %v1665_v26 = vld [vmem:[#allocation8 + $0x44] ss:$16 sps:$4 sm:$0xff]   ;;  %v1663_v27 = vld [vmem:[#allocation8 + $0x40] ss:$16 sps:$4 sm:$0xff]   ;;  %v1654_v56 = vld [vmem:[#allocation8 + $0x8] ss:$16 sps:$4 sm:$0xff]  }
  0x9b   :  { %646 = vmatprep.subr.bf16.mxu0 %v1659_v24  ;;  %v1671_v28 = vld [vmem:[#allocation8 + $0x64] ss:$16 sps:$4 sm:$0xff]   ;;  %v1669_v29 = vld [vmem:[#allocation8 + $0x60] ss:$16 sps:$4 sm:$0xff]   ;;  %v1662_v59 = vld [vmem:[#allocation8 + $0x2c] ss:$16 sps:$4 sm:$0xff]   ;;  %p1926_p4 = pnand %p1925_p3, %p1919_p0 }
  0x9c   :  { %1538 = vmatpush3.bf16.msra.mxu1 %v1640_v10  ;;  %v1677_v30 = vld [vmem:[#allocation8 + $0x84] ss:$16 sps:$4 sm:$0xff]   ;;  %v1675_v31 = vld [vmem:[#allocation8 + $0x80] ss:$16 sps:$4 sm:$0xff]   ;;  %v1660_v4 = vld [vmem:[#allocation8 + $0x28] ss:$16 sps:$4 sm:$0xff]  }
  0x9d   :  { %1539 = vmatprep.subr.bf16.mxu1 %v1641_v11  ;;  %v1683_v32 = vld [vmem:[#allocation8 + $0xa4] ss:$16 sps:$4 sm:$0xff]   ;;  %v1681_v33 = vld [vmem:[#allocation8 + $0xa0] ss:$16 sps:$4 sm:$0xff]   ;;  %v1668_v6 = vld [vmem:[#allocation8 + $0x4c] ss:$16 sps:$4 sm:$0xff]  }
  0x9e   :  { %1429 = vmatmul.mubr.msk.bf16.gmra.mrb[4].mxu0 %vm192_vm0, %v1634_v9  ;;  %v170_v37 = vld [vmem:[%s2337_s4] sm:$0x3]  ;;  %v1666_v10 = vld [vmem:[#allocation8 + $0x48] ss:$16 sps:$4 sm:$0xff]   ;;  %v1674_v11 = vld [vmem:[#allocation8 + $0x6c] ss:$16 sps:$4 sm:$0xff]  }
  0x9f   :  { %676 = vmatprep.mubr.bf16.mxu0 %v2009_v0  ;;  %647 = vmatpush1.bf16.msra.mxu0 %v1657_v25  ;;  %v175_v39 = vrot.slane %v170_v37, %v2243_v36  ;;  %v179_v40 = vrot.slane %v170_v37, %v2248_v38  ;;  %v1695_v21 = vld [vmem:[#allocation8 + $0xe4] ss:$16 sps:$4 sm:$0xff]   ;;  %v1693_v22 = vld [vmem:[#allocation8 + $0xe0] ss:$16 sps:$4 sm:$0xff]   ;;  %v1696_v24 = vld [vmem:[#allocation8 + $0xe8] ss:$16 sps:$4 sm:$0xff]  }
  0xa0   :  { %1540 = vmatpush3.bf16.msra.mxu1 %v1642_v12  ;;  %648 = vmatprep.subr.bf16.mxu0 %v1665_v26  ;;  %v1672_v12 = vld [vmem:[#allocation8 + $0x68] ss:$16 sps:$4 sm:$0xff]   ;;  %v1701_v25 = vld [vmem:[#allocation10 + $0x4] ss:$8 sps:$4 sm:$0xff]  }
  0xa1   :  { %1541 = vmatprep.subr.bf16.mxu1 %v1643_v13  ;;  %v1680_v13 = vld [vmem:[#allocation8 + $0x8c] ss:$16 sps:$4 sm:$0xff]   ;;  %v1723_v26 = vld [vmem:[#allocation11 + $0x40] sm:$0xff]  }
  0xa3   :  { %649 = vmatpush1.bf16.msra.mxu0 %v1663_v27 }
  0xa4   :  { %1542 = vmatpush3.bf16.msra.mxu1 %v1644_v14  ;;  %650 = vmatprep.subr.bf16.mxu0 %v1671_v28  ;;  %v1678_v14 = vld [vmem:[#allocation8 + $0x88] ss:$16 sps:$4 sm:$0xff]  }
  0xa5   :  { %1543 = vmatprep.subr.bf16.mxu1 %v1645_v15  ;;  %v1686_v15 = vld [vmem:[#allocation8 + $0xac] ss:$16 sps:$4 sm:$0xff]  }
  0xa7   :  { %651 = vmatpush1.bf16.msra.mxu0 %v1669_v29 }
  0xa8   :  { %1544 = vmatpush3.bf16.msra.mxu1 %v1646_v16  ;;  %652 = vmatprep.subr.bf16.mxu0 %v1677_v30  ;;  %v1684_v16 = vld [vmem:[#allocation8 + $0xa8] ss:$16 sps:$4 sm:$0xff]  }
  0xa9   :  { %1545 = vmatprep.subr.bf16.mxu1 %v1647_v17  ;;  %v1689_v17 = vld [vmem:[#allocation8 + $0xc4] ss:$16 sps:$4 sm:$0xff]  }
  0xab   :  { %653 = vmatpush1.bf16.msra.mxu0 %v1675_v31  ;;  %v1430_v31 = vld [vmem:[%s2339_s6] ss:$0 sm:$0xff] }
  0xac   :  { %1546 = vmatpush3.bf16.msra.mxu1 %v1648_v18  ;;  %654 = vmatprep.subr.bf16.mxu0 %v1683_v32  ;;  %v1687_v18 = vld [vmem:[#allocation8 + $0xc0] ss:$16 sps:$4 sm:$0xff]  }
  0xad   :  { %1547 = vmatprep.subr.bf16.mxu1 %v1649_v19  ;;  %v1692_v19 = vld [vmem:[#allocation8 + $0xcc] ss:$16 sps:$4 sm:$0xff]  }
  0xaf   :  { %655 = vmatpush1.bf16.msra.mxu0 %v1681_v33 }
  0xb0   :  { %1548 = vmatpush3.bf16.msra.mxu1 %v1650_v20  ;;  %656 = vmatprep.subr.bf16.mxu0 %v1689_v17  ;;  %v1690_v20 = vld [vmem:[#allocation8 + $0xc8] ss:$16 sps:$4 sm:$0xff]  }
  0xb1   :  { %687 = vmatprep.subr.bf16.mxu1 %v1656_v23  ;;  %v1698_v23 = vld [vmem:[#allocation8 + $0xec] ss:$16 sps:$4 sm:$0xff]  }
  0xb3   :  { %657 = vmatpush1.bf16.msra.mxu0 %v1687_v18 }
  0xb4   :  { %658 = vmatprep.subr.bf16.mxu0 %v1695_v21  ;;  %v1742_v21 = vld [vmem:[#allocation13 + $0x48] sm:$0xff]  }
  0xb7   :  { %659 = vmatpush1.bf16.msra.mxu0 %v1693_v22  ;;  %v1743_v22 = vld [vmem:[#allocation13 + $0x8] sm:$0xff]  }
  0xb8   :  { %826 = vmatprep.subr.bf16.mxu0 %v1701_v25  ;;  %v1746_v25 = vld [vmem:[#allocation13 + $0x58] sm:$0xff]  }
 0x169   :  { %v233_v41 = vpop.f32.mrb[0].mxu0 }
 0x16a   :  { %v234_v42 = vadd.f32 %v233_v41, %v175_v39  ;;  %v235_v43 = vpop.f32.mrb[1].mxu0  ;;  %v1704_v41 = vld [vmem:[#allocation10 + $0x14] ss:$8 sps:$4 sm:$0xff]  }
 0x16b   :  { %v236_v44 = vadd.f32 %v235_v43, %v179_v40  ;;  %v237_v45 = vpop.f32.mrb[2].mxu0  ;;  %v1724_v43 = vld [vmem:[#allocation11] sm:$0xff]  }
 0x16c   :  { %v238_v46 = vadd.f32 %v237_v45, %v175_v39  ;;  %v239_v47 = vpop.f32.mrb[3].mxu0  ;;  %v252_v49 = vmax.f32 %v234_v42, 0.0  ;;  %v1725_v45 = vld [vmem:[#allocation11 + $0x48] sm:$0xff]  }
 0x16d   :  { %v240_v48 = vadd.f32 %v239_v47, %v179_v40  ;;  %v253_v51 = vmax.f32 %v236_v44, 0.0 }
 0x16e   :  { %v254_v50 = vmax.f32 %v238_v46, 0.0 }
 0x16f   :  { %v255_v52 = vmax.f32 %v240_v48, 0.0  ;;  %v1702_v48 = vld [vmem:[#allocation10 + $0x10] ss:$8 sps:$4 sm:$0xff]  }
 0x170   :  { %v260_v53 = vpack.c.bf16 %v254_v50, %v252_v49  ;;  %v1707_v50 = vld [vmem:[#allocation10 + $0x24] ss:$8 sps:$4 sm:$0xff]  }
 0x171   :  { %v261_v54 = vpack.c.bf16 %v255_v52, %v253_v51  ;;  %v243_v55 = vpop.f32.mrb[4].mxu0 }
 0x172   :  { %v244_v57 = vadd.f32 %v243_v55, %v175_v39  ;;  %v245_v58 = vpop.f32.mrb[5].mxu0 }
 0x173   :  { %431 = vmatprep.mubr.bf16.mxu1 %v261_v54  ;;  %v246_v60 = vadd.f32 %v245_v58, %v179_v40  ;;  %v247_v61 = vpop.f32.mrb[6].mxu0  ;;  %v1727_v54 = vld [vmem:[#allocation11 + $0x50] sm:$0xff]  }
 0x174   :  { %432 = vmatmul.mubr.bf16.vlgmr.msra.gmra.mrb[0].mxu1 %v260_v53  ;;  %v256_v62 = vmax.f32 %v244_v57, 0.0  ;;  %v248_v63 = vadd.f32 %v247_v61, %v175_v39  ;;  %v249_v1 = vpop.f32.mrb[7].mxu0  ;;  %v1699_v39 = vld [vmem:[#allocation10] ss:$8 sps:$4 sm:$0xff]   ;;  %v1710_v57 = vld [vmem:[#allocation10 + $0x34] ss:$8 sps:$4 sm:$0xff]  }
 0x175   :  { %v257_v2 = vmax.f32 %v246_v60, 0.0  ;;  %v250_v3 = vadd.f32 %v249_v1, %v179_v40  ;;  %688 = vmatpush1.bf16.msra.mxu1 %v1654_v56  ;;  %v1726_v53 = vld [vmem:[#allocation11 + $0x8] sm:$0xff]   ;;  %v1729_v60 = vld [vmem:[#allocation11 + $0x58] sm:$0xff]   ;;  %v1731_v1 = vld [vmem:[#allocation11 + $0x60] sm:$0xff]  }
 0x176   :  { %v258_v5 = vmax.f32 %v248_v63, 0.0  ;;  %689 = vmatprep.subr.bf16.mxu1 %v1662_v59  ;;  %v1705_v56 = vld [vmem:[#allocation10 + $0x20] ss:$8 sps:$4 sm:$0xff]   ;;  %v1728_v59 = vld [vmem:[#allocation11 + $0x10] sm:$0xff]   ;;  %v1730_v63 = vld [vmem:[#allocation11 + $0x18] sm:$0xff]  }
 0x177   :  { %v259_v7 = vmax.f32 %v250_v3, 0.0  ;;  %v1708_v61 = vld [vmem:[#allocation10 + $0x30] ss:$8 sps:$4 sm:$0xff]   ;;  %v1716_v3 = vld [vmem:[#allocation10 + $0x54] ss:$8 sps:$4 sm:$0xff]  }
 0x178   :  { %v262_v8 = vpack.c.bf16 %v258_v5, %v256_v62  ;;  %v1713_v62 = vld [vmem:[#allocation10 + $0x44] ss:$8 sps:$4 sm:$0xff]  }
 0x179   :  { %v263_v9 = vpack.c.bf16 %v259_v7, %v257_v2  ;;  %690 = vmatpush1.bf16.msra.mxu1 %v1660_v4  ;;  %v1711_v2 = vld [vmem:[#allocation10 + $0x40] ss:$8 sps:$4 sm:$0xff]   ;;  %v1719_v7 = vld [vmem:[#allocation10 + $0x64] ss:$8 sps:$4 sm:$0xff]  }
 0x17a   :  { %691 = vmatprep.subr.bf16.mxu1 %v1668_v6  ;;  %v1732_v4 = vld [vmem:[#allocation11 + $0x20] sm:$0xff]   ;;  %v1733_v5 = vld [vmem:[#allocation11 + $0x68] sm:$0xff]   ;;  %v1714_v6 = vld [vmem:[#allocation10 + $0x50] ss:$8 sps:$4 sm:$0xff]  }
 0x17b   :  { %439 = vmatprep.mubr.bf16.mxu1 %v263_v9  ;;  %v1722_v9 = vld [vmem:[#allocation10 + $0x74] ss:$8 sps:$4 sm:$0xff]  }
 0x17c   :  { %440 = vmatmul.mubr.bf16.gmra.mrb[4].mxu1 %v262_v8  ;;  %v1717_v8 = vld [vmem:[#allocation10 + $0x60] ss:$8 sps:$4 sm:$0xff]  }
 0x17d   :  { %692 = vmatpush1.bf16.msra.mxu1 %v1666_v10  ;;  %719 = vmatprep.mubr.bf16.mxu1 %v2009_v0  ;;  %v1720_v10 = vld [vmem:[#allocation10 + $0x70] ss:$8 sps:$4 sm:$0xff]  }
 0x17e   :  { %693 = vmatprep.subr.bf16.mxu1 %v1674_v11  ;;  %v1734_v11 = vld [vmem:[#allocation11 + $0x28] sm:$0xff]  }
 0x181   :  { %694 = vmatpush1.bf16.msra.mxu1 %v1672_v12  ;;  %v1735_v12 = vld [vmem:[#allocation11 + $0x70] sm:$0xff]  }
 0x182   :  { %695 = vmatprep.subr.bf16.mxu1 %v1680_v13  ;;  %v1736_v13 = vld [vmem:[#allocation11 + $0x30] sm:$0xff]  }
 0x185   :  { %696 = vmatpush1.bf16.msra.mxu1 %v1678_v14  ;;  %v1737_v14 = vld [vmem:[#allocation11 + $0x78] sm:$0xff]  }
 0x186   :  { %697 = vmatprep.subr.bf16.mxu1 %v1686_v15  ;;  %v1738_v15 = vld [vmem:[#allocation11 + $0x38] sm:$0xff]  }
 0x189   :  { %698 = vmatpush1.bf16.msra.mxu1 %v1684_v16  ;;  %v1513_v16 = vld.sshfl [vmem:[%s2345_s12] sm:$0x33 pattern:$0x76325410] }
 0x18a   :  { %699 = vmatprep.subr.bf16.mxu1 %v1692_v19  ;;  %v1112_v17 = vcombine.high %v1513_v16, %v1513_v16  ;;  %v1119_v18 = vsel %vm1117_vm1, %v1513_v16, 0  ;;  %v1740_v19 = vld [vmem:[#allocation13 + $0x40] sm:$0xff]  }
 0x18d   :  { %700 = vmatpush1.bf16.msra.mxu1 %v1690_v20  ;;  %v1741_v20 = vld [vmem:[#allocation13] sm:$0xff]  }
 0x18e   :  { %701 = vmatprep.subr.bf16.mxu1 %v1698_v23  ;;  %v1744_v23 = vld [vmem:[#allocation13 + $0x50] sm:$0xff]  }
 0x191   :  { %702 = vmatpush1.bf16.msra.mxu1 %v1696_v24  ;;  %v1745_v24 = vld [vmem:[#allocation13 + $0x10] sm:$0xff]  }
 0x192   :  { %1561 = vmatprep.subr.bf16.mxu1 %v1723_v26  ;;  %v873_v26 = vld [vmem:[%s2342_s9] sm:$0x3] }
 0x247   :  { %v1549_v27 = vpop.f32.mrb[0].mxu1 }
 0x248   :  { %v1550_v28 = vpop.f32.mrb[1].mxu1 }
 0x249   :  { %v1551_v29 = vadd.f32 %v1550_v28, %v1549_v27  ;;  %v1552_v30 = vpop.f32.mrb[2].mxu1  ;;  %v878_v27 = vrot.slane %v873_v26, %v2243_v36  ;;  %v882_v28 = vrot.slane %v873_v26, %v2248_v38 }
 0x24a   :  { %v1553_v32 = vpop.f32.mrb[3].mxu1 }
 0x24b   :  { %v1554_v33 = vadd.f32 %v1553_v32, %v1552_v30  ;;  %v434_v35 = vadd.f32 %v1551_v29, %v1430_v31 }
 0x24d   :  { %v437_v37 = vadd.f32 %v1554_v33, %v1430_v31 }
 0x24f   :  { %v450_v40 = vpack.c.bf16 %v437_v37, %v434_v35  ;;  %v1555_v42 = vpop.f32.mrb[4].mxu1 }
 0x250   :  { %v1556_v44 = vpop.f32.mrb[5].mxu1 }
 0x251   :  { %677 = vmatmul.mubr.bf16.vlgmr.msra.gmra.mrb[8].mxu0 %v450_v40  ;;  %720 = vmatmul.mubr.bf16.vlgmr.msra.gmra.mrb[8].mxu1 %v450_v40  ;;  %v1557_v46 = vadd.f32 %v1556_v44, %v1555_v42  ;;  %v1558_v47 = vpop.f32.mrb[6].mxu1 }
 0x252   :  { %827 = vmatpush1.bf16.msra.mxu0 %v1699_v39  ;;  %v1559_v49 = vpop.f32.mrb[7].mxu1  ;;  %858 = vmatprep.mubr.bf16.mxu0 %v2009_v0 }
 0x253   :  { %828 = vmatprep.subr.bf16.mxu0 %v1704_v41  ;;  %v442_v51 = vadd.f32 %v1557_v46, %v1430_v31  ;;  %v1560_v52 = vadd.f32 %v1559_v49, %v1558_v47  ;;  %1562 = vmatpush3.bf16.msra.mxu1 %v1724_v43  ;;  %v1739_v46 = vld [vmem:[%s2367_s16] sm:$0xff]   ;;  %v1747_v47 = vld [vmem:[#allocation13 + $0x18] sm:$0xff]   ;;  %v1749_v49 = vld [vmem:[#allocation13 + $0x20] sm:$0xff]  }
 0x254   :  { %1563 = vmatprep.subr.bf16.mxu1 %v1725_v45 }
 0x255   :  { %448 = vst [vmem:[#allocation17] sm:$0xff] %v442_v51  ;;  %v445_v55 = vadd.f32 %v1560_v52, %v1430_v31  ;;  %v1752_v52 = vld [vmem:[#allocation13 + $0x70] sm:$0xff]  }
 0x256   :  { %829 = vmatpush1.bf16.msra.mxu0 %v1702_v48  ;;  %v1748_v48 = vld [vmem:[#allocation13 + $0x60] sm:$0xff]  }
 0x257   :  { %830 = vmatprep.subr.bf16.mxu0 %v1707_v50  ;;  %449 = vst [vmem:[#allocation17 + $0x8] sm:$0xff] %v445_v55  ;;  %v451_v58 = vpack.c.bf16 %v445_v55, %v442_v51  ;;  %1564 = vmatpush3.bf16.msra.mxu1 %v1726_v53  ;;  %v1750_v50 = vld [vmem:[#allocation13 + $0x68] sm:$0xff]   ;;  %v1753_v53 = vld [vmem:[#allocation13 + $0x30] sm:$0xff]   ;;  %v1072_v55 = vand.u32 127, %v172_v34 }
 0x258   :  { %1565 = vmatprep.subr.bf16.mxu1 %v1727_v54  ;;  %v1751_v51 = vld [vmem:[#allocation13 + $0x28] sm:$0xff]   ;;  %v1755_v54 = vld [vmem:[#allocation13 + $0x38] sm:$0xff]  }
 0x259   :  { %vm1073_vm3 = vcmp.lt.s32.totalorder %v1072_v55, 4 }
 0x25a   :  { %831 = vmatpush1.bf16.msra.mxu0 %v1705_v56 }
 0x25b   :  { %832 = vmatprep.subr.bf16.mxu0 %v1710_v57  ;;  %1566 = vmatpush3.bf16.msra.mxu1 %v1728_v59 }
 0x25c   :  { %1567 = vmatprep.subr.bf16.mxu1 %v1729_v60 }
 0x25e   :  { %833 = vmatpush1.bf16.msra.mxu0 %v1708_v61  ;;  %v1171_v61 = vld [vmem:[%s2346_s13] sm:$0x3] }
 0x25f   :  { %834 = vmatprep.subr.bf16.mxu0 %v1713_v62  ;;  %1568 = vmatpush3.bf16.msra.mxu1 %v1730_v63  ;;  %v1180_v34 = vrot.slane %v1171_v61, %v2248_v38 }
 0x260   :  { %1569 = vmatprep.subr.bf16.mxu1 %v1731_v1 }
 0x262   :  { %835 = vmatpush1.bf16.msra.mxu0 %v1711_v2  ;;  %v1176_v2 = vrot.slane %v1171_v61, %v2243_v36 }
 0x263   :  { %836 = vmatprep.subr.bf16.mxu0 %v1716_v3  ;;  %1570 = vmatpush3.bf16.msra.mxu1 %v1732_v4 }
 0x264   :  { %1571 = vmatprep.subr.bf16.mxu1 %v1733_v5 }
 0x266   :  { %837 = vmatpush1.bf16.msra.mxu0 %v1714_v6 }
 0x267   :  { %838 = vmatprep.subr.bf16.mxu0 %v1719_v7  ;;  %1572 = vmatpush3.bf16.msra.mxu1 %v1734_v11 }
 0x268   :  { %1573 = vmatprep.subr.bf16.mxu1 %v1735_v12 }
 0x26a   :  { %839 = vmatpush1.bf16.msra.mxu0 %v1717_v8 }
 0x26b   :  { %840 = vmatprep.subr.bf16.mxu0 %v1722_v9  ;;  %1574 = vmatpush3.bf16.msra.mxu1 %v1736_v13 }
 0x26c   :  { %1575 = vmatprep.subr.bf16.mxu1 %v1737_v14 }
 0x26e   :  { %841 = vmatpush1.bf16.msra.mxu0 %v1720_v10 }
 0x26f   :  { %1576 = vmatpush3.bf16.msra.mxu1 %v1738_v15  ;;  %1583 = vmatprep.subr.bf16.mxu0 %v1740_v19 }
 0x270   :  { %1514 = vmatprep.subr.msk.bf16.mxu1 %vm1117_vm1, %v1112_v17 }
 0x271   :  { %859 = vmatmul.mubr.bf16.vlgmr.msra.gmra.mrb[8].mxu0 %v451_v58  ;;  %v1495_v58 = vld [vmem:[%s2344_s11] ss:$0 sm:$0xff] }
 0x272   :  { %1584 = vmatpush3.bf16.msra.mxu0 %v1741_v20 }
 0x273   :  { %1585 = vmatprep.subr.bf16.mxu0 %v1742_v21 }
 0x276   :  { %1586 = vmatpush3.bf16.msra.mxu0 %v1743_v22 }
 0x277   :  { %1587 = vmatprep.subr.bf16.mxu0 %v1744_v23 }
 0x27a   :  { %1588 = vmatpush3.bf16.msra.mxu0 %v1745_v24 }
 0x27b   :  { %1589 = vmatprep.subr.bf16.mxu0 %v1746_v25 }
 0x27e   :  { %1590 = vmatpush3.bf16.msra.mxu0 %v1747_v47 }
 0x27f   :  { %1591 = vmatprep.subr.bf16.mxu0 %v1748_v48 }
 0x282   :  { %1592 = vmatpush3.bf16.msra.mxu0 %v1749_v49 }
 0x283   :  { %1593 = vmatprep.subr.bf16.mxu0 %v1750_v50 }
 0x286   :  { %1594 = vmatpush3.bf16.msra.mxu0 %v1751_v51 }
 0x287   :  { %1595 = vmatprep.subr.bf16.mxu0 %v1752_v52 }
 0x28a   :  { %1596 = vmatpush3.bf16.msra.mxu0 %v1753_v53 }
 0x344   :  { %v860_v29 = vpop.f32.mrb[8].mxu0 }
 0x345   :  { %v885_v30 = vadd.f32 %v878_v27, %v860_v29  ;;  %v862_v31 = vpop.f32.mrb[9].mxu0 }
 0x346   :  { %v886_v32 = vadd.f32 %v882_v28, %v862_v31  ;;  %v864_v33 = vpop.f32.mrb[10].mxu0 }
 0x347   :  { %v887_v35 = vadd.f32 %v878_v27, %v864_v33  ;;  %v866_v37 = vpop.f32.mrb[11].mxu0  ;;  %v889_v40 = vmax.f32 %v885_v30, 0.0  ;;  %v1516_v27 = vld [vmem:[%s2348_s15] ss:$0 sm:$0xff] }
 0x348   :  { %v888_v39 = vadd.f32 %v882_v28, %v866_v37  ;;  %v890_v42 = vmax.f32 %v886_v32, 0.0 }
 0x349   :  { %v891_v41 = vmax.f32 %v887_v35, 0.0 }
 0x34a   :  { %v892_v43 = vmax.f32 %v888_v39, 0.0 }
 0x34b   :  { %v893_v44 = vpack.c.bf16 %v891_v41, %v889_v40 }
 0x34c   :  { %v894_v45 = vpack.c.bf16 %v892_v43, %v890_v42 }
 0x34e   :  { %1062 = vmatprep.mubr.bf16.mxu1 %v894_v45 }
 0x34f   :  { %1063 = vmatmul.mubr.bf16.vlgmr.msra.gmra.mrb[12].mxu1 %v893_v44 }
 0x350   :  { %1125 = vmatpush1.bf16.msra.mxu1 %v1119_v18  ;;  %1156 = vmatprep.mubr.bf16.mxu1 %v2009_v0  ;;  %v1754_v0 = vld [vmem:[#allocation13 + $0x78] sm:$0xff]  }
 0x351   :  { %1597 = vmatprep.subr.bf16.mxu0 %v1754_v0 }
 0x352   :  { %1598 = vmatpush3.bf16.msra.mxu0 %v1755_v54 }
 0x357   :  { %1515 = vmatmul.mubr.msk.bf16.vlgmr.msra.gmra.mrb[8].mxu1 %vm1113_vm2, %v1739_v46 }
 0x422   :  { %v1577_v56 = vpop.f32.mrb[12].mxu1 }
 0x423   :  { %v1578_v57 = vpop.f32.mrb[13].mxu1 }
 0x424   :  { %v1579_v59 = vadd.f32 %v1578_v57, %v1577_v56  ;;  %v1580_v60 = vpop.f32.mrb[14].mxu1 }
 0x425   :  { %v1581_v62 = vpop.f32.mrb[15].mxu1 }
 0x426   :  { %v1582_v63 = vadd.f32 %v1581_v62, %v1580_v60  ;;  %v1065_v1 = vadd.f32 %v1579_v59, %v1495_v58 }
 0x428   :  { %v1074_v3 = vsel %vm1073_vm3, %v1065_v1, -1e+30  ;;  %v1068_v4 = vadd.f32 %v1582_v63, %v1495_v58 }
 0x429   :  { %1076 = vmax.xlane.f32.xlu0 %v1074_v3 }
 0x42a   :  { %v1158_v5 = vpop.f32.mrb[8].mxu1  ;;  %v1075_v10 = vsel %vm1073_vm3, %v1068_v4, -1e+30 }
 0x42b   :  { %v1183_v6 = vadd.f32 %v1176_v2, %v1158_v5  ;;  %v1160_v7 = vpop.f32.mrb[9].mxu1 }
 0x42c   :  { %v1184_v8 = vadd.f32 %v1180_v34, %v1160_v7  ;;  %v1162_v9 = vpop.f32.mrb[10].mxu1 }
 0x42d   :  { %v1185_v11 = vadd.f32 %v1176_v2, %v1162_v9  ;;  %v1164_v12 = vpop.f32.mrb[11].mxu1  ;;  %1078 = vmax.xlane.f32.xlu0 %v1075_v10  ;;  %v1187_v14 = vmax.f32 %v1183_v6, 0.0 }
 0x42e   :  { %v1186_v13 = vadd.f32 %v1180_v34, %v1164_v12  ;;  %v1188_v16 = vmax.f32 %v1184_v8, 0.0 }
 0x42f   :  { %v1189_v15 = vmax.f32 %v1185_v11, 0.0 }
 0x430   :  { %v1190_v17 = vmax.f32 %v1186_v13, 0.0 }
 0x431   :  { %v1191_v36 = vpack.c.bf16 %v1189_v15, %v1187_v14 }
 0x432   :  { %v1192_v18 = vpack.c.bf16 %v1190_v17, %v1188_v16 }
 0x434   :  { %1360 = vmatprep.mubr.bf16.mxu0 %v1192_v18 }
 0x435   :  { %1361 = vmatmul.mubr.bf16.vlgmr.msra.gmra.mrb[12].mxu0 %v1191_v36 }
 0x4b6   :  { %v1077_v38 = vpop.xlane.xlu0 %1076 }
 0x4b7   :  { %v1080_v19 = vsub.f32 %v1074_v3, %v1077_v38 }
 0x4b9   :  { %v1082_v20 = vmul.f32 1.442695, %v1080_v19 }
 0x4ba   :  { %v1079_v21 = vpop.xlane.xlu0 %1078 }
 0x4bb   :  { %1756 = vpow2.f32 %v1082_v20  ;;  %v1081_v22 = vsub.f32 %v1075_v10, %v1079_v21 }
 0x4bd   :  { %v1084_v23 = vmul.f32 1.442695, %v1081_v22 }
 0x4bf   :  { %1758 = vpow2.f32 %v1084_v23 }
 0x4c5   :  { %v1757_v24 = vpop.eup %1756 }
 0x4c6   :  { %1086 = vadd.xlane.f32.xlu1 %v1757_v24 }
 0x4c9   :  { %v1759_v25 = vpop.eup %1758 }
 0x4ca   :  { %1088 = vadd.xlane.f32.xlu1 %v1759_v25 }
 0x508   :  { %v1599_v26 = vpop.f32.mrb[12].mxu0 }
 0x509   :  { %v1600_v28 = vpop.f32.mrb[13].mxu0 }
 0x50a   :  { %v1601_v29 = vadd.f32 %v1600_v28, %v1599_v26  ;;  %v1602_v30 = vpop.f32.mrb[14].mxu0 }
 0x50b   :  { %v1603_v31 = vpop.f32.mrb[15].mxu0 }
 0x50c   :  { %v1363_v32 = vadd.f32 %v1601_v29, %v1516_v27  ;;  %v1604_v33 = vadd.f32 %v1603_v31, %v1602_v30 }
 0x50e   :  { %v1369_v35 = vmax.f32 %v1363_v32, 0.0  ;;  %v1366_v37 = vadd.f32 %v1604_v33, %v1516_v27 }
 0x510   :  { %1371 = vst [vmem:[#allocation15] sm:$0xff] %v1369_v35  ;;  %v1370_v39 = vmax.f32 %v1366_v37, 0.0 }
 0x512   :  { %1372 = vst [vmem:[#allocation15 + $0x8] sm:$0xff] %v1370_v39 }
 0x513   :  { %1929 = shalt.err (!%p1926_p4)
}
 0x514   :  { %s1930_s0 = scalar_lea.hbm %s2350_s17, 256 }
 0x515   :  { %p1931_p5 = scmp.ne.s32.totalorder %s2350_s17, %s1930_s0  ;;  %p1934_p6 = scmp.lt.u32.totalorder %s1930_s0, %s2350_s17 }
 0x517   :  { %p1936_p7 = pnand %p1934_p6, %p1931_p5 }
 0x519   :  { %1939 = shalt.err (!%p1936_p7)
}
 0x51a   :  { %1396 = dma.vmem_to_hbm [thread:$0]  %s1391_s25, 256, %s2350_s17, [#allocation16], %s2006_s5, %s2006_s5, %s2007_s7  }
 0x51b   :  { %s1940_s6 = scalar_lea.vmem %s2281_s8, 256  ;;  %p1945_p9 = scmp.lt.s32.totalorder %s2281_s8, %s2281_s8 }
 0x51c   :  { %p1941_p8 = scmp.ne.s32.totalorder %s2281_s8, %s1940_s6  ;;  %p1946_p10 = scmp.lt.s32.totalorder %s1940_s6, %s1940_s6 }
 0x51e   :  { %p1947_p11 = por %p1946_p10, %p1945_p9 }
 0x520   :  { %p1948_p12 = pnand %p1947_p11, %p1941_p8 }
 0x522   :  { %1951 = shalt.err (!%p1948_p12)
}
 0x523   :  { %s1952_s12 = scalar_lea.hbm %s2351_s18, 256 }
 0x524   :  { %p1953_p13 = scmp.ne.s32.totalorder %s2351_s18, %s1952_s12  ;;  %p1956_p0 = scmp.lt.u32.totalorder %s1952_s12, %s2351_s18 }
 0x526   :  { %p1958_p1 = pnand %p1956_p0, %p1953_p13 }
 0x528   :  { %1961 = shalt.err (!%p1958_p1)
}
 0x529   :  { %1408 = dma.vmem_to_hbm [thread:$0]  %s2281_s8, 256, %s2351_s18, [#allocation16], %s2006_s5, %s2006_s5, %s2007_s7  }
 0x52a   :  { %s2012_s19 = smov [#allocation14]  }
 0x52b   :  { %s1378_s24 = sshll.u32 %s2012_s19, 4  ;;  %s1379_s24 = int_to_ptr.vmem [resolvable:$true] %s1378_s24 }
 0x52c   :  { %s1962_s11 = scalar_lea.vmem %s1379_s24, 256  ;;  %p1967_p3 = scmp.lt.s32.totalorder %s1379_s24, %s1379_s24 }
 0x52d   :  { %p1963_p2 = scmp.ne.s32.totalorder %s1379_s24, %s1962_s11  ;;  %p1968_p4 = scmp.lt.s32.totalorder %s1962_s11, %s1962_s11 }
 0x52f   :  { %p1969_p5 = por %p1968_p4, %p1967_p3 }
 0x531   :  { %p1970_p6 = pnand %p1969_p5, %p1963_p2 }
 0x553   :  { %v1087_v40 = vpop.xlane.xlu1 %1086 }
 0x554   :  { %1760 = vrcp.f32 %v1087_v40 }
 0x557   :  { %v1089_v41 = vpop.xlane.xlu1 %1088 }
 0x558   :  { %1762 = vrcp.f32 %v1089_v41 }
 0x55e   :  { %v1761_v42 = vpop.eup %1760 }
 0x55f   :  { %v1092_v43 = vmul.f32 %v1761_v42, %v1757_v24 }
 0x561   :  { %1094 = vst [vmem:[#allocation14] sm:$0xff] %v1092_v43 }
 0x562   :  { %v1763_v44 = vpop.eup %1762 }
 0x563   :  { %v1093_v45 = vmul.f32 %v1763_v44, %v1759_v25 }
 0x565   :  { %1095 = vst [vmem:[#allocation14 + $0x8] sm:$0xff] %v1093_v45 }
 0x566   :  { %1973 = shalt.err (!%p1970_p6)
}
 0x567   :  { %s2368_s1 = sld [smem:[#allocation27_spill]] }
 0x56d   :  { %s1974_s25 = scalar_lea.hbm %s2368_s1, 256 }
 0x56e   :  { %p1975_p7 = scmp.ne.s32.totalorder %s2368_s1, %s1974_s25  ;;  %p1978_p8 = scmp.lt.u32.totalorder %s1974_s25, %s2368_s1 }
 0x570   :  { %p1980_p9 = pnand %p1978_p8, %p1975_p7 }
 0x572   :  { %1983 = shalt.err (!%p1980_p9)
}
 0x573   :  { %1384 = dma.vmem_to_hbm [thread:$0]  %s1379_s24, 256, %s2368_s1, [#allocation4], %s2006_s5, %s2006_s5, %s2007_s7  }
 0x574   :  { %1992 = dma.done.wait [#allocation4], 256  }
 0x575   :  { %1993 = vsyncadd [#allocation4], 4294967040 }
 0x576   :  { %1994 = dma.done.wait [#allocation16], 512  }
 0x577   :  { %1995 = vsyncadd [#allocation16], 4294966784 }
 0x578   :  { %1418 = vsyncpa [#allocation3], 1 }
 0x579   :  { %1419 = vsyncpa [#allocation6], 1 }
 0x57a   :  { %1420 = vsyncpa [#allocation9], 1 }
 0x57b   :  { %1421 = vsyncpa [#allocation12], 1 }
 0x57c   :  { %1422 = vsyncpa [#allocation4], 1 }
 0x57d   :  { %1423 = vsyncpa [#allocation16], 1 }

</bundles_post_ra>
